<compile_context>
chip_gen: v6e
topology: v6e:2x2x1
jax: 0.10.0
libtpu: 0.0.40
codegen_flags: <defaults>
</compile_context>

<pallas_src>
import functools

import jax
import jax.numpy as jnp
from jax.experimental import pallas as pl
from jax.experimental.pallas import tpu as pltpu


def _round_up(a, b):
    return (a + b - 1) // b * b


def _largest_divisor_tile(np_, tm, cap):
    """Largest multiple of tm that divides np_ and is <= cap (>= tm)."""
    best = tm
    c = tm
    while c <= min(np_, cap):
        if np_ % c == 0:
            best = c
        c += tm
    return best


# --------------------- pass 1: norm + prescaled x1 (bf16) ------------------- #
def _norm_x1_kernel(adj_ref, x_ref, norm_ref, x1_ref, acc_ref):
    k = pl.program_id(1)

    @pl.when(k == 0)
    def _():
        acc_ref[...] = jnp.zeros_like(acc_ref)

    # Row-sum on the MXU (idle in this pass anyway): every output lane holds
    # the same partial row sum, the VPU only pays for the int8 -> bf16 upcast.
    tkn = adj_ref.shape[1]
    ones = jnp.ones((tkn, 128), jnp.bfloat16)
    acc_ref[...] += jnp.dot(adj_ref[...].astype(jnp.bfloat16), ones,
                            preferred_element_type=jnp.float32)

    @pl.when(k == pl.num_programs(1) - 1)
    def _():
        rowsum = acc_ref[:, 0:1]                      # all 128 lanes identical
        norm = jax.lax.rsqrt(1.0 + rowsum)
        norm_ref[...] = norm
        # Prescale x exactly once; bf16 operand for the pass-2 MXU.
        x1_ref[...] = (norm * x_ref[...]).astype(x1_ref.dtype)


# --------------------------- pass 2: fused gcn spmm -------------------------- #
def _gcn_kernel(adj_ref, x1_ref, xi_ref, normi_ref, out_ref, acc_ref, *,
                x1_resident):
    k = pl.program_id(1)
    tk = adj_ref.shape[1]

    @pl.when(k == 0)
    def _():
        # Exact f32 residual x1_i = norm_i * x_i, folded into the accumulator
        # init (x_i / norm_i have index (i,0): fetched once per row block).
        acc_ref[...] = normi_ref[...] * xi_ref[...]

    if x1_resident:
        # x1_bf is fully resident in VMEM: slice the current K window.
        off = pl.multiple_of(k * tk, tk)
        x1_blk = x1_ref[pl.ds(off, tk), :]
    else:
        x1_blk = x1_ref[...]

    # int8 adj upcast on the VPU, bf16 MXU matmul, f32 accumulation.
    acc_ref[...] += jnp.dot(adj_ref[...].astype(jnp.bfloat16), x1_blk,
                            preferred_element_type=jnp.float32)

    @pl.when(k == pl.num_programs(1) - 1)
    def _():
        out_ref[...] = (normi_ref[...] * acc_ref[...]).astype(out_ref.dtype)


# ----------------------------------- wrapper --------------------------------- #
def pure_conv_gcn(x, adj, *, tm=None, tk_cap=2048, tkn_cap=4096):
    """PureConv forward, aggr='gcn', lin=Identity.

    adj is assumed to be a 0/1 adjacency (any dtype); it is stored in HBM as
    int8 (exact for 0/1).  Weighted (non-binary) adjacencies would be rounded
    by the int8/bf16 path and are not supported.
    """
    N, D = x.shape
    assert adj.shape == (N, N)

    # ---- tile selection ------------------------------------------------------
    if tm is None:
        tm = 256 if N >= 2048 else 128
    assert tm % 128 == 0
    base = max(2 * tm, 256)            # even row-block count (2 TCs on v7x)
    Np = _round_up(N, base)
    tk = _largest_divisor_tile(Np, tm, tk_cap)     # matmul-pass K tile
    tkn = _largest_divisor_tile(Np, tm, tkn_cap)   # norm-pass K tile

    x_isz = jnp.dtype(x.dtype).itemsize
    out_isz = x_isz

    # ---- pass-2 VMEM budget: keep x1_bf fully resident when it fits ----------
    VMEM_BUDGET = 24 * 1024 * 1024     # headroom vs 32 MiB default scoped limit

    def pass2_vmem(tk_, resident_):
        est = 2 * tm * tk_                    # adj int8 tiles (double buffered)
        est += 2 * tm * D * x_isz             # x_i residual stream
        est += 2 * tm * 128 * 4               # norm_i (lane-padded in VMEM)
        est += 2 * tm * D * out_isz           # output tile
        est += tm * D * 4                     # f32 accumulator scratch
        est += (2 * Np * D * 2) if resident_ else (2 * tk_ * D * 2)   # x1_bf
        return est

    resident = pass2_vmem(tk, True) <= VMEM_BUDGET
    if not resident:
        # TODO(synk): for very wide D add a D grid axis; for now shrink tk
        # until the streamed (tk, D) x1 block fits (matters most on v7x).
        while pass2_vmem(tk, False) > VMEM_BUDGET and tk > tm:
            tk = _largest_divisor_tile(Np, tm, tk // 2)

    # ---- prepare inputs (no full materialization when already int8+aligned) --
    pad = Np - N
    if adj.dtype != jnp.int8 and pad:
        adj = jnp.pad(adj.astype(jnp.int8), ((0, pad), (0, pad)))
    elif adj.dtype != jnp.int8:
        adj = adj.astype(jnp.int8)
    elif pad:
        adj = jnp.pad(adj, ((0, pad), (0, pad)))
    xp = jnp.pad(x, ((0, pad), (0, 0))) if pad else x

    # ---- pass 1: norm = rsqrt(1 + rowsum(adj)), x1_bf = (norm*x).astype(bf16)
    norm, x1_bf = pl.pallas_call(
        _norm_x1_kernel,
        out_shape=(jax.ShapeDtypeStruct((Np, 1), jnp.float32),
                   jax.ShapeDtypeStruct((Np, D), jnp.bfloat16)),
        grid_spec=pltpu.PrefetchScalarGridSpec(
            num_scalar_prefetch=0,
            grid=(Np // tm, Np // tkn),
            in_specs=[pl.BlockSpec((tm, tkn), lambda i, k: (i, k)),  # adj int8
                      pl.BlockSpec((tm, D), lambda i, k: (i, 0))],   # x rows
            out_specs=[pl.BlockSpec((tm, 1), lambda i, k: (i, 0)),   # norm
                       pl.BlockSpec((tm, D), lambda i, k: (i, 0))],  # x1_bf
            scratch_shapes=[pltpu.VMEM((tm, 128), jnp.float32)],
        ),
        compiler_params=pltpu.CompilerParams(
            dimension_semantics=("parallel", "arbitrary")),
        cost_estimate=pl.CostEstimate(
            flops=2 * Np * Np * 128,
            transcendentals=Np,
            bytes_accessed=Np * Np + Np * D * x_isz + Np * 4 + Np * D * 2),
    )(adj, xp)

    # ---- pass 2: out = norm * (adj @ x1_bf + norm * x) ------------------------
    x1_bytes = Np * D * 2 if resident else (Np // tm) * Np * D * 2
    x1_spec = (pl.BlockSpec((Np, D), lambda i, k: (0, 0)) if resident
               else pl.BlockSpec((tk, D), lambda i, k: (k, 0)))
    out = pl.pallas_call(
        functools.partial(_gcn_kernel, x1_resident=resident),
        out_shape=jax.ShapeDtypeStruct((Np, D), x.dtype),
        grid_spec=pltpu.PrefetchScalarGridSpec(
            num_scalar_prefetch=0,
            grid=(Np // tm, Np // tk),
            in_specs=[
                pl.BlockSpec((tm, tk), lambda i, k: (i, k)),   # adj int8 tile
                x1_spec,                                       # x1_bf (resident or K-streamed)
                pl.BlockSpec((tm, D), lambda i, k: (i, 0)),    # x row block (f32 residual)
                pl.BlockSpec((tm, 1), lambda i, k: (i, 0)),    # norm row block
            ],
            out_specs=pl.BlockSpec((tm, D), lambda i, k: (i, 0)),
            scratch_shapes=[pltpu.VMEM((tm, D), jnp.float32)],
        ),
        compiler_params=pltpu.CompilerParams(
            dimension_semantics=("parallel", "arbitrary")),
        cost_estimate=pl.CostEstimate(
            flops=2 * Np * Np * D,
            transcendentals=0,
            bytes_accessed=Np * Np + x1_bytes + Np * D * x_isz + Np * 4
                           + Np * D * out_isz),
    )(adj, x1_bf, xp, norm)

    return out[:N] if pad else out


# ------------------------------------ main ----------------------------------- #
if __name__ == "__main__":
    # PureConv(indim, outdim) with indim == outdim -> lin is Identity:
    # no learnable parameters to initialize.
    N, D = 256, 128
    key = jax.random.PRNGKey(0)
    kx, ka = jax.random.split(key)

    x = jax.random.normal(kx, (N, D), dtype=jnp.float32)
    # deterministic sparse-ish 0/1 adjacency, stored compactly as int8
    adj = (jax.random.uniform(ka, (N, N)) < 0.05).astype(jnp.int8)

    out = jax.block_until_ready(pure_conv_gcn(x, adj))

    # reference of the gcn branch; mimic the kernel's bf16 rounding of the
    # scaled matmul operand (adj is 0/1 -> exact; residual stays f32)
    adj_f = adj.astype(jnp.float32)
    norm_ref = jax.lax.rsqrt(1.0 + jnp.sum(adj_f, axis=-1, keepdims=True))
    x1 = norm_ref * x
    x1_bf = x1.astype(jnp.bfloat16).astype(jnp.float32)
    ref = norm_ref * (jnp.dot(adj_f, x1_bf,
                              preferred_element_type=jnp.float32) + x1)

    assert out.shape == (N, D) and out.dtype == x.dtype
    assert jnp.allclose(out, ref, atol=2e-3, rtol=2e-3), "mismatch vs reference"
    print("KERNEL_OK")
</pallas_src>

<mosaic_0001>
module attributes {stable_mosaic.version = 11 : i64} {
  func.func @_norm_x1_kernel(%arg0: i32, %arg1: i32, %arg2: memref<128x256xi8, #tpu.memory_space<vmem>>, %arg3: memref<128x128xf32, #tpu.memory_space<vmem>>, %arg4: memref<128x1xf32, #tpu.memory_space<vmem>>, %arg5: memref<128x128xbf16, #tpu.memory_space<vmem>>, %arg6: memref<128x128xf32, #tpu.memory_space<vmem>>) attributes {dimension_semantics = [#tpu.dimension_semantics<parallel>, #tpu.dimension_semantics<arbitrary>], iteration_bounds = array<i64: 2, 1>, scalar_prefetch = 0 : i64, scratch_operands = 1 : i64, tpu.core_type = #tpu.core_type<tc>, window_params = [{transform_indices = @transform_0, window_bounds = array<i64: 128, 256>}, {transform_indices = @transform_1, window_bounds = array<i64: 128, 128>}, {transform_indices = @transform_2, window_bounds = array<i64: 128, 1>}, {transform_indices = @transform_3, window_bounds = array<i64: 128, 128>}]} {
    %c0_i32 = arith.constant 0 : i32
    %0 = arith.cmpi eq, %arg1, %c0_i32 : i32
    %1 = arith.extui %0 : i1 to i32
    %c0_i32_0 = arith.constant 0 : i32
    %2 = arith.cmpi ne, %1, %c0_i32_0 : i32
    scf.if %2 {
      %cst_9 = arith.constant 0.000000e+00 : f32
      %13 = vector.broadcast %cst_9 : f32 to vector<128x128xf32>
      %c0_10 = arith.constant 0 : index
      %c0_11 = arith.constant 0 : index
      %14 = vector.load %arg6[%c0_10, %c0_11] : memref<128x128xf32, #tpu.memory_space<vmem>>, vector<128x128xf32>
      tpu.vector_store %arg6[%c0_10, %c0_11], %13 {strides = array<i32>} : memref<128x128xf32, #tpu.memory_space<vmem>>, vector<128x128xf32>,
    } else {
    }
    %cst = arith.constant 1.000000e+00 : bf16
    %3 = vector.broadcast %cst : bf16 to vector<256x128xbf16>
    %c0 = arith.constant 0 : index
    %c0_1 = arith.constant 0 : index
    %4 = vector.load %arg6[%c0, %c0_1] : memref<128x128xf32, #tpu.memory_space<vmem>>, vector<128x128xf32>
    %c0_2 = arith.constant 0 : index
    %c0_3 = arith.constant 0 : index
    %5 = vector.load %arg2[%c0_2, %c0_3] : memref<128x256xi8, #tpu.memory_space<vmem>>, vector<128x256xi8>
    %6 = arith.sitofp %5 : vector<128x256xi8> to vector<128x256xbf16>
    %cst_4 = arith.constant dense<0.000000e+00> : vector<128x128xf32>
    %7 = tpu.matmul %6, %3, %cst_4 {dimension_numbers = #tpu.dot_dimension_numbers<[1], [0], [0], [1], [0, 0, 1, 1], [], []>} : vector<128x256xbf16>, vector<256x128xbf16>, vector<128x128xf32> -> vector<128x128xf32>
    %8 = arith.addf %4, %7 : vector<128x128xf32>
    %c0_5 = arith.constant 0 : index
    %c0_6 = arith.constant 0 : index
    %9 = vector.load %arg6[%c0_5, %c0_6] : memref<128x128xf32, #tpu.memory_space<vmem>>, vector<128x128xf32>
    tpu.vector_store %arg6[%c0_5, %c0_6], %8 {strides = array<i32>} : memref<128x128xf32, #tpu.memory_space<vmem>>, vector<128x128xf32>,
    %c0_i32_7 = arith.constant 0 : i32
    %10 = arith.cmpi eq, %arg1, %c0_i32_7 : i32
    %11 = arith.extui %10 : i1 to i32
    %c0_i32_8 = arith.constant 0 : i32
    %12 = arith.cmpi ne, %11, %c0_i32_8 : i32
    scf.if %12 {
      %c0_9 = arith.constant 0 : index
      %c0_10 = arith.constant 0 : index
      %13 = vector.load %arg6[%c0_9, %c0_10] : memref<128x128xf32, #tpu.memory_space<vmem>>, vector<128x1xf32>
      %cst_11 = arith.constant 1.000000e+00 : f32
      %14 = vector.broadcast %cst_11 : f32 to vector<128x1xf32>
      %15 = arith.addf %14, %13 : vector<128x1xf32>
      %16 = math.rsqrt %15 : vector<128x1xf32>
      %c0_12 = arith.constant 0 : index
      %c0_13 = arith.constant 0 : index
      %17 = vector.load %arg4[%c0_12, %c0_13] : memref<128x1xf32, #tpu.memory_space<vmem>>, vector<128x1xf32>
      tpu.vector_store %arg4[%c0_12, %c0_13], %16 {strides = array<i32>} : memref<128x1xf32, #tpu.memory_space<vmem>>, vector<128x1xf32>,
      %c0_14 = arith.constant 0 : index
      %c0_15 = arith.constant 0 : index
      %18 = vector.load %arg3[%c0_14, %c0_15] : memref<128x128xf32, #tpu.memory_space<vmem>>, vector<128x128xf32>
      %19 = vector.broadcast %16 : vector<128x1xf32> to vector<128x128xf32>
      %20 = arith.mulf %19, %18 : vector<128x128xf32>
      %21 = arith.truncf %20 : vector<128x128xf32> to vector<128x128xbf16>
      %c0_16 = arith.constant 0 : index
      %c0_17 = arith.constant 0 : index
      %22 = vector.load %arg5[%c0_16, %c0_17] : memref<128x128xbf16, #tpu.memory_space<vmem>>, vector<128x128xbf16>
      tpu.vector_store %arg5[%c0_16, %c0_17], %21 {strides = array<i32>} : memref<128x128xbf16, #tpu.memory_space<vmem>>, vector<128x128xbf16>,
    } else {
    }
    return
  }
  func.func @transform_0(%arg0: i32, %arg1: i32) -> (i32, i32) {
    %c0_i32 = arith.constant 0 : i32
    return %arg0, %arg1 : i32, i32
  }
  func.func @transform_1(%arg0: i32, %arg1: i32) -> (i32, i32) {
    %c0_i32 = arith.constant 0 : i32
    %c0_i32_0 = arith.constant 0 : i32
    return %arg0, %c0_i32 : i32, i32
  }
  func.func @transform_2(%arg0: i32, %arg1: i32) -> (i32, i32) {
    %c0_i32 = arith.constant 0 : i32
    %c0_i32_0 = arith.constant 0 : i32
    return %arg0, %c0_i32 : i32, i32
  }
  func.func @transform_3(%arg0: i32, %arg1: i32) -> (i32, i32) {
    %c0_i32 = arith.constant 0 : i32
    %c0_i32_0 = arith.constant 0 : i32
    return %arg0, %c0_i32 : i32, i32
  }
}

</mosaic_0001>

<bundles_post_ra>
// kernel: tpu_custom_call.1
= control target key start
LH: loop header
LB: loop body
LE: loop exit
PB: predicated region body
PF: predicated region fallthrough
CT: control target
= control target key end

     0   :  { %s1594_s0 = inlined_call_operand.hbm [shape: s8[256,256], index: 0, kind: input, shape index: {}]   ;;  %s1595_s1 = inlined_call_operand.hbm [shape: f32[256,128], index: 1, kind: input, shape index: {}]   ;;  %s1596_s2 = inlined_call_operand.vmem [shape: f32[256,1], index: 2, kind: output, shape index: {0}]   ;;  %s1597_s3 = inlined_call_operand.hbm [shape: bf16[256,128], index: 3, kind: output, shape index: {1}]  }
   0x1   :  { %1598 = sst [smem:[#allocation12_spill]] %s1594_s0 }
   0x2   :  { %9 = vsyncpa [#allocation4], 0 }
   0x3   :  { %11 = vsyncpa [#allocation4 + $0x1], 0 }
   0x4   :  { %12 = vsyncpa [#allocation7], 0 }
   0x5   :  { %14 = vsyncpa [#allocation7 + $0x1], 0 }
   0x6   :  { %15 = vsyncpa [#allocation5], 0 }
   0x7   :  { %17 = vsyncpa [#allocation5 + $0x1], 0  ;;  %s1337_s12 = smov 0   ;;  %s1339_s13 = smov 0  }
   0x8   :  { %s1341_s14 = smov 0   ;;  %s1343_s15 = smov 0  }
   0x9   :  { %s1345_s16 = smov 0   ;;  %s1347_s17 = smov 0  }
   0xa LB: > { %s870_s18 = sadd.s32 4294967295, %s1304_s17   ;;  %s871_s19 = sadd.s32 4294967294, %s1304_s17   ;;  %s1304_s17 = sphi %s1347_s17, %s23_s17   ;;  %s1300_s16 = sphi %s1345_s16, %s1610_s16   ;;  %s1296_s15 = sphi %s1343_s15, %s1609_s15   ;;  %s1292_s14 = sphi %s1341_s14, %s1608_s14   ;;  %s1288_s13 = sphi %s1339_s13, %s1607_s13   ;;  %s1284_s12 = sphi %s1337_s12, %s1606_s12  }
   0xb   : > { %s35_s20 = sadd.s32 1, %s1300_s16  ;;  %s44_s21 = sadd.s32 1, %s1292_s14 }
   0xc   : > { %p37_p0 = scmp.ge.s32.totalorder %s35_s20, 2  ;;  %p51_p1 = scmp.ne.s32.totalorder %s1292_s14, %s1288_s13 }
   0xd   : > { %p52_p2 = scmp.eq.s32.totalorder %s1304_s17, 0  ;;  %p57_p3 = scmp.ne.s32.totalorder %s1288_s13, %s1284_s12 }
   0xe   : > { %s1612_s20 = smov (%p37_p0, %s35_s20), 0  ;;  %p58_p5 = scmp.eq.s32.totalorder %s870_s18, 0 }
   0xf   : > { %p1378_p4 = por %p52_p2, %p51_p1  ;;  %s39_s23 = ssub.s32 %s1300_s16, %s1612_s20 }
  0x10   : > { %p133_p6 = scmp.eq.s32.totalorder %s870_s18, 1  ;;  %p42_p7 = scmp.eq.s32.totalorder %s39_s23, 0 }
  0x11   : > { %p1384_p8 = por %p58_p5, %p57_p3  ;;  %p139_p10 = scmp.eq.s32.totalorder %s871_s19, 1 }
  0x12   : > { %p1388_p9 = por %p133_p6, %p51_p1  ;;  %p873_p12 = scmp.ge.s32.totalorder %s1304_s17, 2 }
  0x13   : > { %s1393_s26 = scalar_select %p42_p7, %s1292_s14, %s44_s21  }
  0x14   : > { %p1395_p11 = por %p139_p10, %p57_p3  ;;  %p1072_p13 = scmp.lt.s32.totalorder %s1304_s17, 2 }
  0x15   : > { %s1402_s28 = sand.u32 1, %s1292_s14   ;;  %s909_s30 = sshll.u32 %s1300_s16, 10 }
  0x16   : > { %s874_s29 = sshll.u32 %s1402_s28, 6  ;;  %s1603_s0 = sld [smem:[#allocation12_spill]] }
  0x17   : > { %s163_s7 = scalar_lea.vmem [#allocation3], %s874_s29  ;;  %p1411_p0 = pnand %p1072_p13, %p1378_p4 }
  0x18   : > { %s173_s8 = sshll.u32 %s163_s7, 4  ;;  %p881_p1 = scmp.ge.s32.totalorder %s1304_s17, 1  ;;  %s174_s8 = int_to_ptr.vmem [resolvable:$true] %s173_s8 }
  0x19   : > { %s160_s10 = scalar_lea.sflag [#allocation4], %s1402_s28  ;;  %p1166_p2 = pneg %p1411_p0 }
  0x1a   : > { %s1177_s11 = scalar_lea.vmem %s174_s8, 1024  ;;  %s1306_s18 = smov [#allocation3]  }
  0x1b   : > { %p1178_p3 = scmp.ne.s32.totalorder %s174_s8, %s1177_s11  ;;  %s1182_s19 = sshll.u32 %s1306_s18, 4  ;;  %s1183_s19 = int_to_ptr.vmem [resolvable:$false] %s1182_s19 }
  0x1c   : > { %s172_s6 = scalar_lea.hbm %s1603_s0, %s909_s30  ;;  %s1184_s21 = scalar_lea.vmem %s1183_s19, 2048 }
  0x1d   : > { %p1180_p5 = pnand %p1178_p3, %p1166_p2  ;;  %p1185_p4 = scmp.lt.s32.totalorder %s174_s8, %s1183_s19 }
  0x1e   : > { %p1186_p7 = scmp.lt.s32.totalorder %s1184_s21, %s1177_s11 }
  0x1f   : > { %p1181_p6 = pneg %p1180_p5 }
  0x20   : > { %p1187_p10 = por %p1186_p7, %p1185_p4 }
  0x22   : > { %p1188_p13 = pnand %p1187_p10, %p1181_p6 }
  0x24   : > { %1191 = shalt.err (!%p1188_p13)
}
  0x25   : > { %s1307_s22 = smov 256   ;;  %s1308_s23 = smov 16  }
  0x26   : > { %1064 = dma.hbm_to_vmem [thread:$0]  (!%p1411_p0), %s172_s6, 1024, %s174_s8, %s160_s10, %s1307_s22, %s1307_s22, %s1308_s23  }
  0x27   : > { %p202_p3 = scmp.lt.s32.totalorder %s1304_s17, 3  ;;  %s878_s29 = sshll.u32 %s1402_s28, 7 }
  0x28   : > { %s910_s30 = sshll.u32 %s1300_s16, 11  ;;  %s187_s18 = scalar_lea.vmem [#allocation6], %s878_s29 }
  0x29   : > { %p1429_p5 = pnand %p881_p1, %p202_p3  ;;  %s193_s11 = scalar_lea.hbm %s1595_s1, %s910_s30 }
  0x2a   : > { %s194_s19 = sshll.u32 %s187_s18, 4  ;;  %s184_s21 = scalar_lea.sflag [#allocation7], %s1402_s28  ;;  %s195_s19 = int_to_ptr.vmem [resolvable:$true] %s194_s19 }
  0x2b   : > { %s1205_s0 = scalar_lea.vmem %s195_s19, 2048  ;;  %s1309_s6 = smov [#allocation6]  }
  0x2c   : > { %p1206_p6 = scmp.ne.s32.totalorder %s195_s19, %s1205_s0  ;;  %s1210_s8 = sshll.u32 %s1309_s6, 4  ;;  %s1211_s8 = int_to_ptr.vmem [resolvable:$false] %s1210_s8 }
  0x2d   : > { %s1212_s10 = scalar_lea.vmem %s1211_s8, 4096  ;;  %p1213_p1 = scmp.lt.s32.totalorder %s195_s19, %s1211_s8 }
  0x2e   : > { %p1208_p4 = pnand %p1206_p6, %p1166_p2  ;;  %p1214_p10 = scmp.lt.s32.totalorder %s1212_s10, %s1205_s0 }
  0x30   : > { %p1209_p7 = pneg %p1208_p4  ;;  %p1215_p13 = por %p1214_p10, %p1213_p1 }
  0x32   : > { %p1216_p3 = pnand %p1215_p13, %p1209_p7 }
  0x34   : > { %1219 = shalt.err (!%p1216_p3)
}
  0x35   : > { %s1310_s22 = smov 128   ;;  %s1311_s23 = smov 8  }
  0x36   : > { %1067 = dma.hbm_to_vmem [thread:$0]  (!%p1411_p0), %s193_s11, 2048, %s195_s19, %s184_s21, %s1310_s22, %s1310_s22, %s1311_s23  }
  0x37   : > { %206 = sbr.rel (%p1429_p5) target bundleno = 485 (0x1e5), region = 28  ;;  %s1445_s28 = sand.u32 (!%p1429_p5), 1, %s1288_s13  }
  0x38   : > { %s882_s29 = sshll.u32 (!%p1429_p5), %s1445_s28, 6  ;;  %s209_s0 = scalar_lea.sflag (!%p1429_p5), [#allocation4], %s1445_s28 }
  0x39   : > { %s1451_s30 = scalar_lea.vmem (!%p1429_p5), [#allocation3], %s882_s29 }
  0x3c   : > { %1271 = dma.done.wait (%p1384_p8), %s209_s0, 1024  }
  0x3d   : > { %1273 = vsyncadd (%p1384_p8), %s209_s0, 4294966272  ;;  %s883_s9 = sshll.u32 %s1445_s28, 7  ;;  %s218_s4 = scalar_lea.sflag [#allocation7], %s1445_s28 }
  0x3e   : > { %s1459_s5 = scalar_lea.vmem [#allocation6], %s883_s9 }
  0x3f   : > { %1275 = dma.done.wait (%p1384_p8), %s218_s4, 2048  }
  0x40   : > { %1277 = vsyncadd (%p1384_p8), %s218_s4, 4294965248  ;;  %v1312_v0 = vmov 1065369472   ;;  %v303_v1 = vld [vmem:[%s1451_s30 + $0x8] sm:$0xff]  ;;  %v302_v5 = vld [vmem:[%s1451_s30] sm:$0xff]  ;;  %v1313_v25 = vmov 0  }
  0x41   : > { %975 = vmatprep.subr.bf16.mxu0 %v1312_v0  ;;  %1039 = vmatprep.subr.bf16.mxu1 %v1312_v0  ;;  %v307_v2 = vld [vmem:[%s1451_s30 + $0x28] sm:$0xff]  ;;  %v311_v3 = vunpack.c.l.s8.bf16 %v303_v1  ;;  %v306_v6 = vld [vmem:[%s1451_s30 + $0x20] sm:$0xff]  ;;  %v310_v7 = vunpack.c.l.s8.bf16 %v302_v5  ;;  %v313_v9 = vunpack.c.h.s8.bf16 %v303_v1  ;;  %v305_v11 = vld [vmem:[%s1451_s30 + $0x18] sm:$0xff]  ;;  %v312_v13 = vunpack.c.h.s8.bf16 %v302_v5  ;;  %s885_s24 = sshll.u32 %s1296_s15, 4  ;;  %s1517_s21 = scalar_lea.vmem [#allocation8], %s882_s29 }
  0x42   : > { %976 = vmatpush3.bf16.msra.mxu0 %v1312_v0  ;;  %1047 = vmatpush3.bf16.msra.mxu1 %v1312_v0  ;;  %v319_v4 = vunpack.c.l.s8.bf16 %v307_v2  ;;  %v318_v8 = vunpack.c.l.s8.bf16 %v306_v6  ;;  %v321_v10 = vunpack.c.h.s8.bf16 %v307_v2  ;;  %v309_v12 = vld [vmem:[%s1451_s30 + $0x38] sm:$0xff]  ;;  %v320_v14 = vunpack.c.h.s8.bf16 %v306_v6  ;;  %v304_v17 = vld [vmem:[%s1451_s30 + $0x10] sm:$0xff]  ;;  %p258_p8 = scmp.lt.s32.totalorder %s885_s24, 31  ;;  %s738_s6 = sshll.u32 %s1517_s21, 4  ;;  %s1539_s6 = int_to_ptr.vmem [resolvable:$true] %s738_s6 }
  0x43   : > { %977 = vmatprep.subr.bf16.mxu0 %v1312_v0  ;;  %1040 = vmatprep.subr.bf16.mxu1 %v1312_v0  ;;  %v315_v15 = vunpack.c.l.s8.bf16 %v305_v11  ;;  %v323_v16 = vunpack.c.l.s8.bf16 %v309_v12  ;;  %v308_v18 = vld [vmem:[%s1451_s30 + $0x30] sm:$0xff]  ;;  %v314_v19 = vunpack.c.l.s8.bf16 %v304_v17  ;;  %v317_v21 = vunpack.c.h.s8.bf16 %v305_v11  ;;  %s927_s8 = sshll.u32 %s1296_s15, 10  ;;  %s721_s29 = scalar_lea.sflag [#allocation5], %s1445_s28 }
  0x44   : > { %358 = vmatprep.mubr.bf16.mxu0 %v311_v3  ;;  %390 = vmatprep.mubr.bf16.mxu1 %v319_v4  ;;  %v322_v20 = vunpack.c.l.s8.bf16 %v308_v18  ;;  %v325_v22 = vunpack.c.h.s8.bf16 %v309_v12  ;;  %v316_v23 = vunpack.c.h.s8.bf16 %v304_v17  ;;  %v324_v24 = vunpack.c.h.s8.bf16 %v308_v18  ;;  %s1614_s24 = smov (!%p258_p8, %s885_s24), 31  ;;  %s1545_s23 = scalar_lea.hbm %s1597_s3, %s927_s8 }
  0x45   : > { %1130 = vset.pattern.permute.xlu0 %v1313_v25  ;;  %1131 = vset.pattern.permute.xlu1 %v1313_v25  ;;  %s886_s7 = sshll.u32 %s1614_s24, 3  ;;  %vm506_vm0 = vcmask 7168   ;;  %s1220_s0 = scalar_lea.vmem %s1539_s6, 1024 }
  0x46   : > { %978 = vmatpush3.bf16.msra.mxu0 %v1312_v0  ;;  %1048 = vmatpush3.bf16.msra.mxu1 %v1312_v0  ;;  %s1477_s19 = scalar_lea.vmem %s1596_s2, %s886_s7  ;;  %p1221_p0 = scmp.ne.s32.totalorder %s1539_s6, %s1220_s0 }
  0x47   : > { %979 = vmatprep.subr.bf16.mxu0 %v1312_v0  ;;  %1041 = vmatprep.subr.bf16.mxu1 %v1312_v0  ;;  %s1314_s15 = smov [#allocation8]  }
  0x48   : > { %p1222_p2 = pnand %p1221_p0, %p1388_p9  ;;  %s1224_s30 = sshll.u32 %s1314_s15, 4  ;;  %s1225_s30 = int_to_ptr.vmem [resolvable:$false] %s1224_s30 }
  0x49   : > { %s1226_s9 = scalar_lea.vmem %s1225_s30, 2048  ;;  %p1227_p6 = scmp.lt.s32.totalorder %s1539_s6, %s1225_s30 }
  0x4a   : > { %980 = vmatpush3.bf16.msra.mxu0 %v1312_v0  ;;  %1049 = vmatpush3.bf16.msra.mxu1 %v1312_v0  ;;  %p1223_p5 = pneg %p1222_p2  ;;  %p1228_p4 = scmp.lt.s32.totalorder %s1226_s9, %s1220_s0 }
  0x4b   : > { %981 = vmatprep.subr.bf16.mxu0 %v1312_v0  ;;  %1042 = vmatprep.subr.bf16.mxu1 %v1312_v0 }
  0x4c   : > { %p1229_p7 = por %p1228_p4, %p1227_p6 }
  0x4e   : > { %982 = vmatpush3.bf16.msra.mxu0 %v1312_v0  ;;  %1050 = vmatpush3.bf16.msra.mxu1 %v1312_v0  ;;  %p1230_p1 = pnand %p1229_p7, %p1223_p5 }
  0x4f   : > { %983 = vmatprep.subr.bf16.mxu0 %v1312_v0  ;;  %1043 = vmatprep.subr.bf16.mxu1 %v1312_v0 }
  0x52   : > { %984 = vmatpush3.bf16.msra.mxu0 %v1312_v0  ;;  %1051 = vmatpush3.bf16.msra.mxu1 %v1312_v0 }
  0x53   : > { %985 = vmatprep.subr.bf16.mxu0 %v1312_v0  ;;  %1044 = vmatprep.subr.bf16.mxu1 %v1312_v0 }
  0x56   : > { %986 = vmatpush3.bf16.msra.mxu0 %v1312_v0  ;;  %1052 = vmatpush3.bf16.msra.mxu1 %v1312_v0 }
  0x57   : > { %987 = vmatprep.subr.bf16.mxu0 %v1312_v0  ;;  %1045 = vmatprep.subr.bf16.mxu1 %v1312_v0 }
  0x5a   : > { %988 = vmatpush3.bf16.msra.mxu0 %v1312_v0  ;;  %1053 = vmatpush3.bf16.msra.mxu1 %v1312_v0 }
  0x5b   : > { %989 = vmatprep.subr.bf16.mxu0 %v1312_v0  ;;  %1046 = vmatprep.subr.bf16.mxu1 %v1312_v0 }
  0x5e   : > { %990 = vmatpush3.bf16.msra.mxu0 %v1312_v0  ;;  %1054 = vmatpush3.bf16.msra.mxu1 %v1312_v0 }
  0x61   : > { %359 = vmatmul.mubr.bf16.vlgmr.msra.gmra.mxu0 %v310_v7  ;;  %391 = vmatmul.mubr.bf16.vlgmr.msra.gmra.mxu1 %v318_v8 }
  0x62   : > { %366 = vmatprep.mubr.bf16.mxu0 %v313_v9  ;;  %398 = vmatprep.mubr.bf16.mxu1 %v321_v10 }
  0x69   : > { %367 = vmatmul.mubr.bf16.gmra.mxu0 %v312_v13  ;;  %399 = vmatmul.mubr.bf16.gmra.mxu1 %v320_v14 }
  0x6a   : > { %374 = vmatprep.mubr.bf16.mxu0 %v315_v15  ;;  %406 = vmatprep.mubr.bf16.mxu1 %v323_v16 }
  0x71   : > { %375 = vmatmul.mubr.bf16.gmra.mxu0 %v314_v19  ;;  %407 = vmatmul.mubr.bf16.gmra.mxu1 %v322_v20 }
  0x72   : > { %382 = vmatprep.mubr.bf16.mxu0 %v317_v21  ;;  %414 = vmatprep.mubr.bf16.mxu1 %v325_v22 }
  0x79   : > { %383 = vmatmul.mubr.bf16.gmra.mxu0 %v316_v23  ;;  %415 = vmatmul.mubr.bf16.gmra.mxu1 %v324_v24 }
 0x121   : > { %v991_v26 = vpop.f32.mrf.mxu0  ;;  %v1015_v27 = vpop.f32.mrf.mxu1 }
 0x123   : > { %v992_v28 = vpop.f32.mrf.mxu0  ;;  %v1016_v29 = vpop.f32.mrf.mxu1 }
 0x124   : > { %v993_v30 = vadd.f32 %v992_v28, %v991_v26  ;;  %v1017_v31 = vadd.f32 %v1016_v29, %v1015_v27 }
 0x125   : > { %v994_v32 = vpop.f32.mrf.mxu0  ;;  %v1018_v33 = vpop.f32.mrf.mxu1 }
 0x126   : > { %v474_v34 = vadd.f32 1.0, %v993_v30  ;;  %v482_v35 = vadd.f32 1.0, %v1017_v31 }
 0x127   : > { %v995_v36 = vpop.f32.mrf.mxu0  ;;  %v1019_v37 = vpop.f32.mrf.mxu1 }
 0x128   : > { %1132 = vrsqrt.f32 %v474_v34  ;;  %v996_v38 = vadd.f32 %v995_v36, %v994_v32  ;;  %v1020_v39 = vadd.f32 %v1019_v37, %v1018_v33 }
 0x129   : > { %1134 = vrsqrt.f32 %v482_v35  ;;  %v997_v40 = vpop.f32.mrf.mxu0  ;;  %v1021_v41 = vpop.f32.mrf.mxu1 }
 0x12a   : > { %v475_v42 = vadd.f32 1.0, %v996_v38  ;;  %v483_v43 = vadd.f32 1.0, %v1020_v39 }
 0x12b   : > { %v998_v44 = vpop.f32.mrf.mxu0  ;;  %v1022_v45 = vpop.f32.mrf.mxu1 }
 0x12c   : > { %1136 = vrsqrt.f32 %v475_v42  ;;  %v999_v46 = vadd.f32 %v998_v44, %v997_v40  ;;  %v1023_v47 = vadd.f32 %v1022_v45, %v1021_v41  ;;  %v532_v44 = vld [vmem:[%s1459_s5 + $0x48] sm:$0xff] }
 0x12d   : > { %1138 = vrsqrt.f32 %v483_v43  ;;  %v1000_v48 = vpop.f32.mrf.mxu0  ;;  %v1024_v49 = vpop.f32.mrf.mxu1  ;;  %v531_v43 = vld [vmem:[%s1459_s5 + $0x40] sm:$0xff] }
 0x12e   : > { %v476_v50 = vadd.f32 1.0, %v999_v46  ;;  %v484_v51 = vadd.f32 1.0, %v1023_v47 }
 0x12f   : > { %v1001_v52 = vpop.f32.mrf.mxu0  ;;  %v1025_v53 = vpop.f32.mrf.mxu1 }
 0x130   : > { %1140 = vrsqrt.f32 %v476_v50  ;;  %v1002_v54 = vadd.f32 %v1001_v52, %v1000_v48  ;;  %v1026_v55 = vadd.f32 %v1025_v53, %v1024_v49  ;;  %v523_v48 = vld [vmem:[%s1459_s5] sm:$0xff]  ;;  %v524_v50 = vld [vmem:[%s1459_s5 + $0x8] sm:$0xff] }
 0x131   : > { %1142 = vrsqrt.f32 %v484_v51  ;;  %v1003_v56 = vpop.f32.mrf.mxu0  ;;  %v1027_v57 = vpop.f32.mrf.mxu1 }
 0x132   : > { %v477_v58 = vadd.f32 1.0, %v1002_v54  ;;  %v485_v59 = vadd.f32 1.0, %v1026_v55 }
 0x133   : > { %v1004_v60 = vpop.f32.mrf.mxu0  ;;  %v1028_v61 = vpop.f32.mrf.mxu1 }
 0x134   : > { %1144 = vrsqrt.f32 %v477_v58  ;;  %v1005_v62 = vadd.f32 %v1004_v60, %v1003_v56  ;;  %v1029_v63 = vadd.f32 %v1028_v61, %v1027_v57  ;;  %v525_v56 = vld [vmem:[%s1459_s5 + $0x10] sm:$0xff]  ;;  %v526_v58 = vld [vmem:[%s1459_s5 + $0x18] sm:$0xff] }
 0x135   : > { %v1133_v0 = vpop.eup %1132  ;;  %1146 = vrsqrt.f32 %v485_v59  ;;  %v1006_v1 = vpop.f32.mrf.mxu0 }
 0x136   : > { %v1030_v2 = vpop.f32.mrf.mxu1  ;;  %v1135_v3 = vpop.eup %1134  ;;  %507 = vst.msk [vmem:[%s1477_s19] sm:$0xff] %vm506_vm0, %v1133_v0  ;;  %v478_v4 = vadd.f32 1.0, %v1005_v62  ;;  %v486_v5 = vadd.f32 1.0, %v1029_v63  ;;  %541 = vperm.xlu0 %1130, %v1133_v0   ;;  %v533_v63 = vld [vmem:[%s1459_s5 + $0x50] sm:$0xff]  ;;  %v534_v0 = vld [vmem:[%s1459_s5 + $0x58] sm:$0xff] }
 0x137   : > { %515 = vst.msk [vmem:[%s1477_s19 + $0x40] sm:$0xff] %vm506_vm0, %v1135_v3  ;;  %v1007_v6 = vpop.f32.mrf.mxu0 }
 0x138   : > { %v1031_v7 = vpop.f32.mrf.mxu1  ;;  %1148 = vrsqrt.f32 %v478_v4  ;;  %v1008_v8 = vadd.f32 %v1007_v6, %v1006_v1  ;;  %v527_v6 = vld [vmem:[%s1459_s5 + $0x20] sm:$0xff] }
 0x139   : > { %v1032_v9 = vadd.f32 %v1031_v7, %v1030_v2  ;;  %v1137_v10 = vpop.eup %1136  ;;  %1150 = vrsqrt.f32 %v486_v5  ;;  %v1009_v11 = vpop.f32.mrf.mxu0  ;;  %v528_v7 = vld [vmem:[%s1459_s5 + $0x28] sm:$0xff] }
 0x13a   : > { %v1033_v12 = vpop.f32.mrf.mxu1  ;;  %v1139_v13 = vpop.eup %1138  ;;  %508 = vst.msk [vmem:[%s1477_s19 + $0x8] sm:$0xff] %vm506_vm0, %v1137_v10  ;;  %v479_v14 = vadd.f32 1.0, %v1008_v8  ;;  %581 = vperm.xlu0 %1130, %v1135_v3  }
 0x13b   : > { %v487_v15 = vadd.f32 1.0, %v1032_v9  ;;  %516 = vst.msk [vmem:[%s1477_s19 + $0x48] sm:$0xff] %vm506_vm0, %v1139_v13  ;;  %586 = vperm.xlu1 %1131, %v1139_v13   ;;  %v1010_v16 = vpop.f32.mrf.mxu0  ;;  %v535_v13 = vld [vmem:[%s1459_s5 + $0x60] sm:$0xff] }
 0x13c   : > { %v1034_v17 = vpop.f32.mrf.mxu1  ;;  %1152 = vrsqrt.f32 %v479_v14  ;;  %v1011_v18 = vadd.f32 %v1010_v16, %v1009_v11  ;;  %v536_v14 = vld [vmem:[%s1459_s5 + $0x68] sm:$0xff] }
 0x13d   : > { %v1035_v19 = vadd.f32 %v1034_v17, %v1033_v12  ;;  %v1141_v20 = vpop.eup %1140  ;;  %1154 = vrsqrt.f32 %v487_v15  ;;  %v1012_v21 = vpop.f32.mrf.mxu0 }
 0x13e   : > { %v1036_v22 = vpop.f32.mrf.mxu1  ;;  %v1143_v23 = vpop.eup %1142  ;;  %509 = vst.msk [vmem:[%s1477_s19 + $0x10] sm:$0xff] %vm506_vm0, %v1141_v20  ;;  %v480_v24 = vadd.f32 1.0, %v1011_v18  ;;  %546 = vperm.xlu0 %1130, %v1137_v10  }
 0x13f   : > { %v488_v25 = vadd.f32 1.0, %v1035_v19  ;;  %517 = vst.msk [vmem:[%s1477_s19 + $0x50] sm:$0xff] %vm506_vm0, %v1143_v23  ;;  %551 = vperm.xlu1 %1131, %v1141_v20   ;;  %v1013_v26 = vpop.f32.mrf.mxu0  ;;  %v529_v20 = vld [vmem:[%s1459_s5 + $0x30] sm:$0xff] }
 0x140   : > { %v1037_v27 = vpop.f32.mrf.mxu1  ;;  %1156 = vrsqrt.f32 %v480_v24  ;;  %v1014_v28 = vadd.f32 %v1013_v26, %v1012_v21  ;;  %v530_v21 = vld [vmem:[%s1459_s5 + $0x38] sm:$0xff]  ;;  %v537_v26 = vld [vmem:[%s1459_s5 + $0x70] sm:$0xff] }
 0x141   : > { %v1038_v29 = vadd.f32 %v1037_v27, %v1036_v22  ;;  %v1145_v30 = vpop.eup %1144  ;;  %1158 = vrsqrt.f32 %v488_v25 }
 0x142   : > { %v1147_v31 = vpop.eup %1146  ;;  %510 = vst.msk [vmem:[%s1477_s19 + $0x18] sm:$0xff] %vm506_vm0, %v1145_v30  ;;  %v481_v32 = vadd.f32 1.0, %v1014_v28  ;;  %591 = vperm.xlu0 %1130, %v1143_v23   ;;  %v538_v28 = vld [vmem:[%s1459_s5 + $0x78] sm:$0xff] }
 0x143   : > { %v489_v33 = vadd.f32 1.0, %v1038_v29  ;;  %518 = vst.msk [vmem:[%s1477_s19 + $0x58] sm:$0xff] %vm506_vm0, %v1147_v31  ;;  %556 = vperm.xlu1 %1131, %v1145_v30  }
 0x144   : > { %1160 = vrsqrt.f32 %v481_v32 }
 0x145   : > { %v1149_v34 = vpop.eup %1148  ;;  %1162 = vrsqrt.f32 %v489_v33 }
 0x146   : > { %v1151_v35 = vpop.eup %1150  ;;  %511 = vst.msk [vmem:[%s1477_s19 + $0x20] sm:$0xff] %vm506_vm0, %v1149_v34  ;;  %561 = vperm.xlu0 %1130, %v1149_v34  }
 0x147   : > { %519 = vst.msk [vmem:[%s1477_s19 + $0x60] sm:$0xff] %vm506_vm0, %v1151_v35  ;;  %596 = vperm.xlu1 %1131, %v1147_v31  }
 0x149   : > { %v1153_v36 = vpop.eup %1152 }
 0x14a   : > { %v1155_v37 = vpop.eup %1154  ;;  %512 = vst.msk [vmem:[%s1477_s19 + $0x28] sm:$0xff] %vm506_vm0, %v1153_v36  ;;  %601 = vperm.xlu0 %1130, %v1151_v35  }
 0x14b   : > { %520 = vst.msk [vmem:[%s1477_s19 + $0x68] sm:$0xff] %vm506_vm0, %v1155_v37  ;;  %566 = vperm.xlu1 %1131, %v1153_v36  }
 0x14d   : > { %v1157_v38 = vpop.eup %1156 }
 0x14e   : > { %v1159_v39 = vpop.eup %1158  ;;  %513 = vst.msk [vmem:[%s1477_s19 + $0x30] sm:$0xff] %vm506_vm0, %v1157_v38  ;;  %571 = vperm.xlu0 %1130, %v1157_v38  }
 0x14f   : > { %521 = vst.msk [vmem:[%s1477_s19 + $0x70] sm:$0xff] %vm506_vm0, %v1159_v39  ;;  %606 = vperm.xlu1 %1131, %v1155_v37  }
 0x151   : > { %v1161_v40 = vpop.eup %1160 }
 0x152   : > { %v1163_v41 = vpop.eup %1162  ;;  %514 = vst.msk [vmem:[%s1477_s19 + $0x38] sm:$0xff] %vm506_vm0, %v1161_v40  ;;  %611 = vperm.xlu0 %1130, %v1159_v39  }
 0x153   : > { %522 = vst.msk [vmem:[%s1477_s19 + $0x78] sm:$0xff] %vm506_vm0, %v1163_v41  ;;  %576 = vperm.xlu1 %1131, %v1161_v40  }
 0x157   : > { %616 = vperm.xlu1 %1131, %v1163_v41  }
 0x1b1   : > { %v542_v42 = vpop.permute.xlu0 %541 }
 0x1b2   : > { %v619_v53 = vmul.f32 %v542_v42, %v523_v48 }
 0x1b5   : > { %v582_v45 = vpop.permute.xlu0 %581 }
 0x1b6   : > { %v587_v46 = vpop.permute.xlu1 %586  ;;  %v627_v47 = vmul.f32 %v582_v45, %v531_v43 }
 0x1b7   : > { %v628_v49 = vmul.f32 %v587_v46, %v532_v44 }
 0x1b9   : > { %v951_v51 = vpack.c.bf16 %v628_v49, %v627_v47  ;;  %v547_v52 = vpop.permute.xlu0 %546 }
 0x1ba   : > { %v552_v54 = vpop.permute.xlu1 %551  ;;  %v620_v55 = vmul.f32 %v547_v52, %v524_v50 }
 0x1bb   : > { %971 = vst [vmem:[%s1517_s21 + $0x20] sm:$0xff] %v951_v51   ;;  %v621_v61 = vmul.f32 %v552_v54, %v525_v56 }
 0x1bc   : > { %v931_v57 = vpack.c.bf16 %v620_v55, %v619_v53 }
 0x1bd   : > { %v592_v59 = vpop.permute.xlu0 %591 }
 0x1be   : > { %932 = vst [vmem:[%s1517_s21] sm:$0xff] %v931_v57   ;;  %v557_v60 = vpop.permute.xlu1 %556  ;;  %v629_v4 = vmul.f32 %v592_v59, %v533_v63 }
 0x1bf   : > { %v622_v62 = vmul.f32 %v557_v60, %v526_v58 }
 0x1c1   : > { %v936_v1 = vpack.c.bf16 %v622_v62, %v621_v61  ;;  %v562_v2 = vpop.permute.xlu0 %561 }
 0x1c2   : > { %v597_v3 = vpop.permute.xlu1 %596  ;;  %v623_v11 = vmul.f32 %v562_v2, %v527_v6 }
 0x1c3   : > { %968 = vst [vmem:[%s1517_s21 + $0x8] sm:$0xff] %v936_v1   ;;  %v630_v5 = vmul.f32 %v597_v3, %v534_v0 }
 0x1c5   : > { %v956_v8 = vpack.c.bf16 %v630_v5, %v629_v4  ;;  %v602_v9 = vpop.permute.xlu0 %601 }
 0x1c6   : > { %v567_v10 = vpop.permute.xlu1 %566  ;;  %v631_v18 = vmul.f32 %v602_v9, %v535_v13 }
 0x1c7   : > { %972 = vst [vmem:[%s1517_s21 + $0x28] sm:$0xff] %v956_v8   ;;  %v624_v12 = vmul.f32 %v567_v10, %v528_v7 }
 0x1c9   : > { %v941_v15 = vpack.c.bf16 %v624_v12, %v623_v11  ;;  %v572_v17 = vpop.permute.xlu0 %571 }
 0x1ca   : > { %v607_v16 = vpop.permute.xlu1 %606  ;;  %v625_v24 = vmul.f32 %v572_v17, %v529_v20 }
 0x1cb   : > { %969 = vst [vmem:[%s1517_s21 + $0x10] sm:$0xff] %v941_v15   ;;  %v632_v19 = vmul.f32 %v607_v16, %v536_v14 }
 0x1cd   : > { %v961_v22 = vpack.c.bf16 %v632_v19, %v631_v18  ;;  %v612_v27 = vpop.permute.xlu0 %611 }
 0x1ce   : > { %v577_v23 = vpop.permute.xlu1 %576  ;;  %v633_v31 = vmul.f32 %v612_v27, %v537_v26 }
 0x1cf   : > { %973 = vst [vmem:[%s1517_s21 + $0x30] sm:$0xff] %v961_v22   ;;  %v626_v25 = vmul.f32 %v577_v23, %v530_v21 }
 0x1d1   : > { %v946_v29 = vpack.c.bf16 %v626_v25, %v625_v24 }
 0x1d2   : > { %v617_v30 = vpop.permute.xlu1 %616 }
 0x1d3   : > { %970 = vst [vmem:[%s1517_s21 + $0x18] sm:$0xff] %v946_v29   ;;  %v634_v32 = vmul.f32 %v617_v30, %v538_v28 }
 0x1d5   : > { %v966_v33 = vpack.c.bf16 %v634_v32, %v633_v31 }
 0x1d7   : > { %974 = vst [vmem:[%s1517_s21 + $0x38] sm:$0xff] %v966_v33  }
 0x1d8   : > { %1233 = shalt.err (!%p1230_p1)
}
 0x1d9   : > { %s1234_s4 = scalar_lea.hbm %s1545_s23, 1024  ;;  %s1238_s7 = scalar_lea.hbm %s1597_s3, 2048 }
 0x1da   : > { %p1235_p10 = scmp.ne.s32.totalorder %s1545_s23, %s1234_s4  ;;  %p1239_p8 = scmp.lt.s32.totalorder %s1545_s23, %s1597_s3 }
 0x1db   : > { %p1240_p0 = scmp.lt.s32.totalorder %s1238_s7, %s1234_s4 }
 0x1dc   : > { %p1236_p13 = pnand %p1235_p10, %p1388_p9 }
 0x1dd   : > { %p1241_p2 = por %p1240_p0, %p1239_p8 }
 0x1de   : > { %p1237_p3 = pneg %p1236_p13 }
 0x1e0   : > { %p1242_p5 = pnand %p1241_p2, %p1237_p3 }
 0x1e2   : > { %1245 = shalt.err (!%p1242_p5)
}
 0x1e3   : > { %s1315_s19 = smov 64   ;;  %s1316_s21 = smov 4  }
 0x1e4   : > { %1059 = dma.vmem_to_hbm [thread:$0]  (%p1388_p9), %s1539_s6, 1024, %s1545_s23, %s721_s29, %s1315_s19, %s1315_s19, %s1316_s21  }
 0x1e5 PF: > { %s761_s8 = sand.u32 1, %s1284_s12   ;;  %p1069_p6 = pnand %p873_p12, %p1395_p11 }
 0x1e6   : > { %s762_s10 = scalar_lea.sflag [#allocation5], %s761_s8 }
 0x1e7   : > { %p1070_p4 = pneg %p1069_p6 }
 0x1e9   : > { %1279 = dma.done.wait (%p1070_p4), %s762_s10, 1024  }
 0x1ea   : > { %1281 = vsyncadd (%p1070_p4), %s762_s10, 4294966272  ;;  %s23_s17 = sadd.s32 1, %s1304_s17   ;;  %s1606_s12 = smov %s1288_s13 }
 0x1eb   : > { %p20_p7 = scmp.ge.s32.totalorder %s23_s17, 4   ;;  %s1607_s13 = smov %s1292_s14 }
 0x1ec   : > { %s1608_s14 = smov %s1393_s26  ;;  %s1609_s15 = smov %s1300_s16 }
 0x1ed   : > { %s1610_s16 = smov %s1612_s20  ;;  %22 = sbr.rel (!%p20_p7) target bundleno = 10 (0xa), region = 106 }
 0x1f2   :  { %767 = vsyncpa [#allocation4], 1 }
 0x1f3   :  { %769 = vsyncpa [#allocation4 + $0x1], 1 }
 0x1f4   :  { %770 = vsyncpa [#allocation7], 1 }
 0x1f5   :  { %772 = vsyncpa [#allocation7 + $0x1], 1 }
 0x1f6   :  { %773 = vsyncpa [#allocation5], 1 }
 0x1f7   :  { %775 = vsyncpa [#allocation5 + $0x1], 1 }

</bundles_post_ra>
